<compile_context>
chip_gen: v7x
topology: tpu7x:2x2x1
jax: 0.10.0
libtpu: 0.0.40
codegen_flags: <defaults>
</compile_context>

<pallas_src>
import math
import jax
import jax.numpy as jnp
from jax.experimental import pallas as pl
from jax.experimental.pallas import tpu as pltpu


def _round_up(v, m):
    return ((v + m - 1) // m) * m


def _pad_to(a, shape):
    pads = [(0, t - s) for s, t in zip(a.shape, shape)]
    if all(p == (0, 0) for p in pads):
        return a
    return jnp.pad(a, pads)


def _vmem_limit(footprint_bytes):
    # Generous margin, floored at the v6e/v7x default scoped limit, and kept
    # well under v7x's 64 MiB physical VMEM.
    return int(min(max(4 * footprint_bytes, 32 * 1024 * 1024),
                   48 * 1024 * 1024))


# ---------------------------------------------------------------------------
# Kernel bodies
# ---------------------------------------------------------------------------

def _fused_adj_x_w_kernel(adj_ref, x_ref, w_ref, b_ref, o_ref, acc_ref):
    """node[i] = relu((sum_k adj[i,k] @ x[k]) @ w + b)   (used when Fin<=Fout)."""
    k = pl.program_id(2)

    @pl.when(k == 0)
    def _():
        acc_ref[...] = jnp.zeros_like(acc_ref)

    acc_ref[...] += jnp.dot(adj_ref[0], x_ref[0],
                            preferred_element_type=jnp.float32)

    @pl.when(k == pl.num_programs(2) - 1)
    def _():
        agg = acc_ref[...].astype(w_ref.dtype)           # bf16 for the MXU
        node = jnp.dot(agg, w_ref[...], preferred_element_type=jnp.float32)
        node = node + b_ref[...]                         # (1, Fout_p) broadcast
        o_ref[0] = jnp.maximum(node, 0.0).astype(o_ref.dtype)


def _xw_kernel(x_ref, w_ref, s_ref):
    """support = x @ w (one row tile per grid step, computed ONCE per batch)."""
    s_ref[0] = jnp.dot(x_ref[0], w_ref[...],
                       preferred_element_type=jnp.float32).astype(s_ref.dtype)


def _adj_support_kernel(adj_ref, s_ref, b_ref, o_ref, acc_ref):
    """node[i] = relu(sum_k adj[i,k] @ support[k] + b)   (used when Fin>Fout)."""
    k = pl.program_id(2)

    @pl.when(k == 0)
    def _():
        acc_ref[...] = jnp.zeros_like(acc_ref)

    acc_ref[...] += jnp.dot(adj_ref[0], s_ref[0],
                            preferred_element_type=jnp.float32)

    @pl.when(k == pl.num_programs(2) - 1)
    def _():
        node = acc_ref[...] + b_ref[...]
        o_ref[0] = jnp.maximum(node, 0.0).astype(o_ref.dtype)


# ---------------------------------------------------------------------------
# Wrapper
# ---------------------------------------------------------------------------

def graph_convolution(x, adj, weight, bias=None, *,
                      compute_dtype=jnp.bfloat16, max_tile=256):
    """GraphConvolution forward: relu(adj @ (x @ weight) + bias)."""
    B, N, Fin = x.shape
    Fin_w, Fout = weight.shape
    assert Fin_w == Fin and adj.shape == (B, N, N)
    out_dtype = x.dtype
    if bias is None:
        bias = jnp.zeros((Fout,), jnp.float32)

    # ---- tile / padding selection -------------------------------------
    if N <= max_tile:
        tile = _round_up(max(N, 8), 16)       # single tile covers padded N
    else:
        tile = max_tile                        # tiled contraction: lane rule
        assert tile % 128 == 0, "max_tile must be a multiple of 128"
    n_pad = _round_up(N, tile)
    fout_pad = _round_up(Fout, 128)            # lane-dense output stores
    n_tiles = n_pad // tile

    cbytes = jnp.dtype(compute_dtype).itemsize
    obytes = jnp.dtype(out_dtype).itemsize

    xc = _pad_to(x.astype(compute_dtype), (B, n_pad, Fin))
    adjc = _pad_to(adj.astype(compute_dtype), (B, n_pad, n_pad))
    wc = _pad_to(weight.astype(compute_dtype), (Fin, fout_pad))
    bc = _pad_to(bias.astype(jnp.float32).reshape(1, Fout), (1, fout_pad))

    if Fin <= Fout:
        # Fused single kernel: relu((adj @ x) @ w + b).
        cost = pl.CostEstimate(
            flops=int(2 * B * (n_pad * n_pad * Fin + n_pad * Fin * fout_pad)),
            transcendentals=0,
            bytes_accessed=int(adjc.size * cbytes + xc.size * cbytes
                               + wc.size * cbytes + bc.size * 4
                               + B * n_pad * fout_pad * obytes))
        footprint = (2 * tile * tile * cbytes        # adj tiles (double buffer)
                     + 2 * tile * Fin * cbytes       # x tiles
                     + Fin * fout_pad * cbytes       # weight (resident)
                     + fout_pad * 4                  # bias
                     + 2 * tile * fout_pad * obytes  # out tiles
                     + tile * Fin * 4)               # f32 accumulator
        out_p = pl.pallas_call(
            _fused_adj_x_w_kernel,
            out_shape=jax.ShapeDtypeStruct((B, n_pad, fout_pad), out_dtype),
            grid_spec=pltpu.PrefetchScalarGridSpec(
                num_scalar_prefetch=0,
                grid=(B, n_tiles, n_tiles),
                in_specs=[
                    pl.BlockSpec((1, tile, tile), lambda b, i, k: (b, i, k)),
                    pl.BlockSpec((1, tile, Fin), lambda b, i, k: (b, k, 0)),
                    pl.BlockSpec((Fin, fout_pad), lambda b, i, k: (0, 0)),
                    pl.BlockSpec((1, fout_pad), lambda b, i, k: (0, 0)),
                ],
                out_specs=pl.BlockSpec((1, tile, fout_pad),
                                       lambda b, i, k: (b, i, 0)),
                scratch_shapes=[pltpu.VMEM((tile, Fin), jnp.float32)],
            ),
            compiler_params=pltpu.CompilerParams(
                dimension_semantics=("parallel", "parallel", "arbitrary"),
                vmem_limit_bytes=_vmem_limit(footprint)),
            cost_estimate=cost,
        )(adjc, xc, wc, bc)
    else:
        # Stage 1: support = x @ w, computed once (not per adj row tile),
        # stored in compute dtype to halve HBM traffic for stage 2.
        cost1 = pl.CostEstimate(
            flops=int(2 * B * n_pad * Fin * fout_pad),
            transcendentals=0,
            bytes_accessed=int(xc.size * cbytes + wc.size * cbytes
                               + B * n_pad * fout_pad * cbytes))
        fp1 = (2 * tile * Fin * cbytes + Fin * fout_pad * cbytes
               + 2 * tile * fout_pad * cbytes)
        support = pl.pallas_call(
            _xw_kernel,
            out_shape=jax.ShapeDtypeStruct((B, n_pad, fout_pad), compute_dtype),
            grid_spec=pltpu.PrefetchScalarGridSpec(
                num_scalar_prefetch=0,
                grid=(B, n_tiles),
                in_specs=[
                    pl.BlockSpec((1, tile, Fin), lambda b, i: (b, i, 0)),
                    pl.BlockSpec((Fin, fout_pad), lambda b, i: (0, 0)),
                ],
                out_specs=pl.BlockSpec((1, tile, fout_pad),
                                       lambda b, i: (b, i, 0)),
            ),
            compiler_params=pltpu.CompilerParams(
                dimension_semantics=("parallel", "parallel"),
                vmem_limit_bytes=_vmem_limit(fp1)),
            cost_estimate=cost1,
        )(xc, wc)

        # Stage 2: node = relu(adj @ support + b), adj tiled over rows & k.
        cost2 = pl.CostEstimate(
            flops=int(2 * B * n_pad * n_pad * fout_pad),
            transcendentals=0,
            bytes_accessed=int(adjc.size * cbytes + support.size * cbytes
                               + bc.size * 4 + B * n_pad * fout_pad * obytes))
        fp2 = (2 * tile * tile * cbytes + 2 * tile * fout_pad * cbytes
               + fout_pad * 4 + 2 * tile * fout_pad * obytes
               + tile * fout_pad * 4)
        out_p = pl.pallas_call(
            _adj_support_kernel,
            out_shape=jax.ShapeDtypeStruct((B, n_pad, fout_pad), out_dtype),
            grid_spec=pltpu.PrefetchScalarGridSpec(
                num_scalar_prefetch=0,
                grid=(B, n_tiles, n_tiles),
                in_specs=[
                    pl.BlockSpec((1, tile, tile), lambda b, i, k: (b, i, k)),
                    pl.BlockSpec((1, tile, fout_pad), lambda b, i, k: (b, k, 0)),
                    pl.BlockSpec((1, fout_pad), lambda b, i, k: (0, 0)),
                ],
                out_specs=pl.BlockSpec((1, tile, fout_pad),
                                       lambda b, i, k: (b, i, 0)),
                scratch_shapes=[pltpu.VMEM((tile, fout_pad), jnp.float32)],
            ),
            compiler_params=pltpu.CompilerParams(
                dimension_semantics=("parallel", "parallel", "arbitrary"),
                vmem_limit_bytes=_vmem_limit(fp2)),
            cost_estimate=cost2,
        )(adjc, support, bc)

    # TODO(synk): batch_norm / residual / dropout / non-relu activations are
    # disabled in the default module config and are not implemented here.
    return out_p[:, :N, :Fout]


# ---------------------------------------------------------------------------
# Self-test
# ---------------------------------------------------------------------------

def _reference(x, adj, weight, bias):
    support = jnp.einsum("bnf,fo->bno", x, weight)
    node = jnp.einsum("bnm,bmo->bno", adj, support)
    node = node + bias
    return jnp.maximum(node, 0.0)


def _make_inputs(key, B, N, Fin, Fout):
    kx, kadj, kw, kb = jax.random.split(key, 4)
    x = jax.random.normal(kx, (B, N, Fin), dtype=jnp.float32)
    adj_raw = jax.random.uniform(kadj, (B, N, N), dtype=jnp.float32)
    adj = adj_raw / jnp.sum(adj_raw, axis=-1, keepdims=True)
    # reset_parameters(): uniform(-stdv, stdv), stdv = 1/sqrt(out_features)
    stdv = 1.0 / math.sqrt(Fout)
    weight = jax.random.uniform(kw, (Fin, Fout), minval=-stdv, maxval=stdv,
                                dtype=jnp.float32)
    bias = jax.random.uniform(kb, (Fout,), minval=-stdv, maxval=stdv,
                              dtype=jnp.float32)
    return x, adj, weight, bias


if __name__ == "__main__":
    key = jax.random.PRNGKey(0)
    cases = [
        # (B, N, Fin, Fout, max_tile)
        (2, 16, 32, 32, 256),    # Fin == Fout -> fused (adj@x)@w path, 1 tile
        (2, 16, 64, 32, 256),    # Fin >  Fout -> two-stage x@w + adj@support
        (1, 320, 32, 32, 128),   # exercises row/contraction tiling + N pad
    ]
    for idx, (B, N, Fin, Fout, max_tile) in enumerate(cases):
        x, adj, weight, bias = _make_inputs(jax.random.fold_in(key, idx),
                                            B, N, Fin, Fout)
        out = graph_convolution(x, adj, weight, bias, max_tile=max_tile)
        out = jax.block_until_ready(out)
        ref = _reference(x, adj, weight, bias)
        assert out.shape == (B, N, Fout)
        err = float(jnp.max(jnp.abs(out - ref)))
        # bf16 MXU inputs with f32 accumulation -> loosened tolerance.
        assert jnp.allclose(out, ref, atol=2e-2, rtol=2e-2), (
            f"case {idx}: mismatch vs reference (max abs err {err:.3e})")

    print("KERNEL_OK")
</pallas_src>

<mosaic_0001>
module attributes {stable_mosaic.version = 11 : i64} {
  func.func @_fused_adj_x_w_kernel(%arg0: i32, %arg1: i32, %arg2: i32, %arg3: memref<1x16x16xbf16, #tpu.memory_space<vmem>>, %arg4: memref<1x16x32xbf16, #tpu.memory_space<vmem>>, %arg5: memref<32x128xbf16, #tpu.memory_space<vmem>>, %arg6: memref<1x128xf32, #tpu.memory_space<vmem>>, %arg7: memref<1x16x128xf32, #tpu.memory_space<vmem>>, %arg8: memref<16x32xf32, #tpu.memory_space<vmem>>) attributes {dimension_semantics = [#tpu.dimension_semantics<parallel>, #tpu.dimension_semantics<parallel>, #tpu.dimension_semantics<arbitrary>], iteration_bounds = array<i64: 2, 1, 1>, scalar_prefetch = 0 : i64, scratch_operands = 1 : i64, tpu.core_type = #tpu.core_type<tc>, window_params = [{transform_indices = @transform_0, window_bounds = array<i64: 1, 16, 16>}, {transform_indices = @transform_1, window_bounds = array<i64: 1, 16, 32>}, {pipeline_mode = #tpu.pipeline_mode<synchronous>, transform_indices = @transform_2, window_bounds = array<i64: 32, 128>}, {pipeline_mode = #tpu.pipeline_mode<synchronous>, transform_indices = @transform_3, window_bounds = array<i64: 1, 128>}, {transform_indices = @transform_4, window_bounds = array<i64: 1, 16, 128>}]} {
    %c0_i32 = arith.constant 0 : i32
    %0 = arith.cmpi eq, %arg2, %c0_i32 : i32
    %1 = arith.extui %0 : i1 to i32
    %c0_i32_0 = arith.constant 0 : i32
    %2 = arith.cmpi ne, %1, %c0_i32_0 : i32
    scf.if %2 {
      %cst_12 = arith.constant 0.000000e+00 : f32
      %14 = vector.broadcast %cst_12 : f32 to vector<16x32xf32>
      %c0_13 = arith.constant 0 : index
      %c0_14 = arith.constant 0 : index
      %15 = vector.load %arg8[%c0_13, %c0_14] : memref<16x32xf32, #tpu.memory_space<vmem>>, vector<16x32xf32>
      tpu.vector_store %arg8[%c0_13, %c0_14], %14 {strides = array<i32>} : memref<16x32xf32, #tpu.memory_space<vmem>>, vector<16x32xf32>,
    } else {
    }
    %c0 = arith.constant 0 : index
    %c0_1 = arith.constant 0 : index
    %3 = vector.load %arg8[%c0, %c0_1] : memref<16x32xf32, #tpu.memory_space<vmem>>, vector<16x32xf32>
    %c0_2 = arith.constant 0 : index
    %c0_3 = arith.constant 0 : index
    %c0_4 = arith.constant 0 : index
    %4 = vector.load %arg3[%c0_2, %c0_3, %c0_4] : memref<1x16x16xbf16, #tpu.memory_space<vmem>>, vector<1x16x16xbf16>
    %5 = vector.shape_cast %4 : vector<1x16x16xbf16> to vector<16x16xbf16>
    %c0_5 = arith.constant 0 : index
    %c0_6 = arith.constant 0 : index
    %c0_7 = arith.constant 0 : index
    %6 = vector.load %arg4[%c0_5, %c0_6, %c0_7] : memref<1x16x32xbf16, #tpu.memory_space<vmem>>, vector<1x16x32xbf16>
    %7 = vector.shape_cast %6 : vector<1x16x32xbf16> to vector<16x32xbf16>
    %cst = arith.constant dense<0.000000e+00> : vector<16x32xf32>
    %8 = tpu.matmul %5, %7, %cst {dimension_numbers = #tpu.dot_dimension_numbers<[1], [0], [0], [1], [0, 0, 1, 1], [], []>} : vector<16x16xbf16>, vector<16x32xbf16>, vector<16x32xf32> -> vector<16x32xf32>
    %9 = arith.addf %3, %8 : vector<16x32xf32>
    %c0_8 = arith.constant 0 : index
    %c0_9 = arith.constant 0 : index
    %10 = vector.load %arg8[%c0_8, %c0_9] : memref<16x32xf32, #tpu.memory_space<vmem>>, vector<16x32xf32>
    tpu.vector_store %arg8[%c0_8, %c0_9], %9 {strides = array<i32>} : memref<16x32xf32, #tpu.memory_space<vmem>>, vector<16x32xf32>,
    %c0_i32_10 = arith.constant 0 : i32
    %11 = arith.cmpi eq, %arg2, %c0_i32_10 : i32
    %12 = arith.extui %11 : i1 to i32
    %c0_i32_11 = arith.constant 0 : i32
    %13 = arith.cmpi ne, %12, %c0_i32_11 : i32
    scf.if %13 {
      %c0_12 = arith.constant 0 : index
      %c0_13 = arith.constant 0 : index
      %14 = vector.load %arg8[%c0_12, %c0_13] : memref<16x32xf32, #tpu.memory_space<vmem>>, vector<16x32xf32>
      %15 = arith.truncf %14 : vector<16x32xf32> to vector<16x32xbf16>
      %c0_14 = arith.constant 0 : index
      %c0_15 = arith.constant 0 : index
      %16 = vector.load %arg5[%c0_14, %c0_15] : memref<32x128xbf16, #tpu.memory_space<vmem>>, vector<32x128xbf16>
      %cst_16 = arith.constant dense<0.000000e+00> : vector<16x128xf32>
      %17 = tpu.matmul %15, %16, %cst_16 {dimension_numbers = #tpu.dot_dimension_numbers<[1], [0], [0], [1], [0, 0, 1, 1], [], []>} : vector<16x32xbf16>, vector<32x128xbf16>, vector<16x128xf32> -> vector<16x128xf32>
      %c0_17 = arith.constant 0 : index
      %c0_18 = arith.constant 0 : index
      %18 = vector.load %arg6[%c0_17, %c0_18] : memref<1x128xf32, #tpu.memory_space<vmem>>, vector<1x128xf32>
      %19 = vector.broadcast %18 : vector<1x128xf32> to vector<16x128xf32>
      %20 = arith.addf %17, %19 : vector<16x128xf32>
      %cst_19 = arith.constant 0.000000e+00 : f32
      %21 = vector.broadcast %cst_19 : f32 to vector<16x128xf32>
      %22 = arith.maximumf %20, %21 : vector<16x128xf32>
      %c0_20 = arith.constant 0 : index
      %c0_21 = arith.constant 0 : index
      %c0_22 = arith.constant 0 : index
      %23 = vector.load %arg7[%c0_20, %c0_21, %c0_22] : memref<1x16x128xf32, #tpu.memory_space<vmem>>, vector<1x16x128xf32>
      %24 = vector.shape_cast %23 : vector<1x16x128xf32> to vector<16x128xf32>
      %25 = vector.shape_cast %22 : vector<16x128xf32> to vector<1x16x128xf32>
      tpu.vector_store %arg7[%c0_20, %c0_21, %c0_22], %25 {strides = array<i32>} : memref<1x16x128xf32, #tpu.memory_space<vmem>>, vector<1x16x128xf32>,
    } else {
    }
    return
  }
  func.func @transform_0(%arg0: i32, %arg1: i32, %arg2: i32) -> (i32, i32, i32) {
    %c0_i32 = arith.constant 0 : i32
    return %arg0, %arg1, %arg2 : i32, i32, i32
  }
  func.func @transform_1(%arg0: i32, %arg1: i32, %arg2: i32) -> (i32, i32, i32) {
    %c0_i32 = arith.constant 0 : i32
    %c0_i32_0 = arith.constant 0 : i32
    return %arg0, %arg2, %c0_i32 : i32, i32, i32
  }
  func.func @transform_2(%arg0: i32, %arg1: i32, %arg2: i32) -> (i32, i32) {
    %c0_i32 = arith.constant 0 : i32
    %c0_i32_0 = arith.constant 0 : i32
    %c0_i32_1 = arith.constant 0 : i32
    return %c0_i32, %c0_i32_0 : i32, i32
  }
  func.func @transform_3(%arg0: i32, %arg1: i32, %arg2: i32) -> (i32, i32) {
    %c0_i32 = arith.constant 0 : i32
    %c0_i32_0 = arith.constant 0 : i32
    %c0_i32_1 = arith.constant 0 : i32
    return %c0_i32, %c0_i32_0 : i32, i32
  }
  func.func @transform_4(%arg0: i32, %arg1: i32, %arg2: i32) -> (i32, i32, i32) {
    %c0_i32 = arith.constant 0 : i32
    %c0_i32_0 = arith.constant 0 : i32
    return %arg0, %arg1, %c0_i32 : i32, i32, i32
  }
}

</mosaic_0001>

<bundles_post_ra>
// kernel: tpu_custom_call.1
= control target key start
LH: loop header
LB: loop body
LE: loop exit
PB: predicated region body
PF: predicated region fallthrough
CT: control target
= control target key end

     0   :  { %s1227_s0 = inlined_call_operand.hbm [shape: bf16[2,16,16], index: 0, kind: input, shape index: {}]   ;;  %s1228_s1 = inlined_call_operand.hbm [shape: bf16[2,16,32], index: 1, kind: input, shape index: {}]   ;;  %s1229_s2 = inlined_call_operand.hbm [shape: bf16[32,128], index: 2, kind: input, shape index: {}]   ;;  %s1230_s3 = inlined_call_operand.vmem [shape: f32[1,128], index: 3, kind: input, shape index: {}]   ;;  %s1231_s4 = inlined_call_operand.hbm [shape: f32[2,16,128], index: 4, kind: output, shape index: {}]  }
   0x1   :  { %1240 = sst [smem:[#allocation15_spill]] %s1227_s0 }
   0x2   :  { %1241 = sst [smem:[#allocation16_spill]] %s1229_s2 }
   0x3   :  { %9 = vsyncpa [#allocation4], 0 }
   0x4   :  { %11 = vsyncpa [#allocation4 + $0x1], 0 }
   0x5   :  { %12 = vsyncpa [#allocation7], 0 }
   0x6   :  { %14 = vsyncpa [#allocation7 + $0x1], 0 }
   0x7   :  { %15 = vsyncpa [#allocation5], 0 }
   0x8   :  { %17 = vsyncpa [#allocation5 + $0x1], 0  ;;  %s952_s15 = smov 0   ;;  %s954_s16 = smov 0  }
   0x9   :  { %s956_s17 = smov 0   ;;  %s958_s18 = smov 0  }
   0xa   :  { %s960_s19 = smov 0   ;;  %s962_s20 = smov 0  }
   0xb LB: > { %s983_s21 = sadd.s32 4294967295, %s915_s20   ;;  %s600_s22 = sadd.s32 4294967294, %s915_s20   ;;  %s915_s20 = sphi %s962_s20, %s23_s20   ;;  %s911_s19 = sphi %s960_s19, %s1266_s19   ;;  %s907_s18 = sphi %s958_s18, %s1265_s18   ;;  %s903_s17 = sphi %s956_s17, %s1264_s17   ;;  %s899_s16 = sphi %s954_s16, %s1263_s16   ;;  %s895_s15 = sphi %s952_s15, %s1262_s15  }
   0xc   : > { %p66_p0 = scmp.ne.s32.totalorder %s899_s16, %s895_s15  ;;  %p1232_p1 = scmp.eq.s32.totalorder %s983_s21, 0 }
   0xd   : > { %p168_p3 = scmp.eq.s32.totalorder %s600_s22, 1  ;;  %p601_p5 = scmp.ge.s32.totalorder %s915_s20, 1 }
   0xe   : > { %p992_p4 = por %p1232_p1, %p66_p0  ;;  %p175_p7 = scmp.lt.s32.totalorder %s915_s20, 3 }
   0xf   : > { %p997_p6 = por %p168_p3, %p66_p0  ;;  %s917_s26 = smov [#allocation8]  }
  0x10   : > { %s1242_s23 = scalar_select %p992_p4, 1, 0 }
  0x11   : > { %s1243_s24 = scalar_select %p997_p6, 1, 0 }
  0x12   : > { %p1002_p8 = pnand %p601_p5, %p175_p7  ;;  %s187_s27 = sshll.u32 %s917_s26, 4  ;;  %s188_s27 = int_to_ptr.vmem [resolvable:$true] %s187_s27 }
  0x13   : > { %s42_s29 = sadd.s32 1, %s911_s19  ;;  %s1246_s2 = sld [smem:[#allocation16_spill]] }
  0x14   : > { %s1244_s25 = scalar_select %p1002_p8, 1, 0 }
  0x15   : > { %p659_p9 = pneg %p1002_p8 }
  0x17   : > { %p1011_p11 = pnand %p659_p9, %p1232_p1 }
  0x19   : > { %s737_s6 = scalar_lea.hbm %s1246_s2, 256  ;;  %p739_p13 = pneg %p1011_p11 }
  0x1a   : > { %p738_p12 = scmp.ne.s32.totalorder %s1246_s2, %s737_s6  ;;  %p744_p5 = scmp.lt.u32.totalorder %s737_s6, %s1246_s2 }
  0x1c   : > { %p740_p0 = pnand %p739_p13, %p738_p12 }
  0x1e   : > { %p741_p3 = pneg %p740_p0 }
  0x20   : > { %p746_p7 = pnand %p744_p5, %p741_p3 }
  0x22   : > { %749 = shalt.err (!%p746_p7)
}
  0x23   : > { %s750_s11 = scalar_lea.vmem %s188_s27, 256  ;;  %p758_p2 = scmp.lt.s32.totalorder %s188_s27, %s188_s27 }
  0x24   : > { %p751_p9 = scmp.ne.s32.totalorder %s188_s27, %s750_s11  ;;  %p759_p6 = scmp.lt.s32.totalorder %s750_s11, %s750_s11 }
  0x26   : > { %p753_p10 = pnand %p751_p9, %p739_p13  ;;  %p760_p4 = por %p759_p6, %p758_p2 }
  0x28   : > { %p754_p1 = pneg %p753_p10 }
  0x2a   : > { %p761_p8 = pnand %p760_p4, %p754_p1 }
  0x2c   : > { %764 = shalt.err (!%p761_p8)
}
  0x2d   : > { %s1235_s12 = smov 64   ;;  %s1237_s13 = smov 4  }
  0x2e   : > { %662 = dma.hbm_to_vmem [thread:$0]  (!%p1011_p11), %s1246_s2, 256, %s188_s27, [#allocation7], %s1235_s12, %s1235_s12, %s1237_s13  }
  0x2f   : > { %p44_p1 = scmp.ge.s32.totalorder %s42_s29, 2  ;;  %s53_s26 = sadd.s32 1, %s903_s17 }
  0x30   : > { %p60_p2 = scmp.ne.s32.totalorder %s903_s17, %s899_s16  ;;  %p61_p4 = scmp.eq.s32.totalorder %s915_s20, 0 }
  0x31   : > { %s1268_s29 = smov (%p44_p1, %s42_s29), 0  ;;  %p1249_p8 = scmp.eq.s32.totalorder %s983_s21, 1 }
  0x32   : > { %1247 = sst [smem:[#allocation14_spill]] %s1268_s29  ;;  %p1041_p6 = por %p61_p4, %p60_p2 }
  0x33   : > { %p1047_p10 = por %p1249_p8, %p60_p2  ;;  %s46_s5 = ssub.s32 %s911_s19, %s1268_s29 }
  0x34   : > { %p675_p12 = scmp.lt.s32.totalorder %s915_s20, 2  ;;  %p51_p11 = scmp.eq.s32.totalorder %s46_s5, 0 }
  0x35   : > { %s204_s27 = sand.u32 1, %s903_s17   ;;  %s627_s8 = sshll.u32 %s911_s19, 7 }
  0x36   : > { %s604_s6 = sshll.u32 %s204_s27, 3  ;;  %s1251_s0 = sld [smem:[#allocation15_spill]] }
  0x37   : > { %s1056_s7 = scalar_select %p51_p11, %s903_s17, %s53_s26  }
  0x38   : > { %s208_s14 = scalar_lea.vmem [#allocation3], %s604_s6  ;;  %p1068_p13 = pnand %p675_p12, %p1041_p6 }
  0x39   : > { %s218_s22 = sshll.u32 %s208_s14, 4  ;;  %s1075_s9 = scalar_lea.hbm %s1228_s1, %s627_s8  ;;  %s1064_s22 = int_to_ptr.vmem [resolvable:$true] %s218_s22 }
  0x3a   : > { %s232_s10 = scalar_lea.vmem [#allocation6], %s604_s6  ;;  %s1079_s2 = scalar_lea.sflag [#allocation4], %s204_s27 }
  0x3b   : > { %s1077_s13 = sshll.u32 %s232_s10, 4  ;;  %p767_p3 = pneg %p1068_p13  ;;  %s1111_s13 = int_to_ptr.vmem [resolvable:$true] %s1077_s13 }
  0x3c   : > { %s1062_s11 = scalar_lea.hbm %s1251_s0, %s627_s8  ;;  %s770_s12 = scalar_lea.hbm %s1251_s0, 256 }
  0x3d   : > { %s765_s14 = scalar_lea.hbm %s1062_s11, 128  ;;  %p771_p9 = scmp.lt.u32.totalorder %s1062_s11, %s1251_s0 }
  0x3e   : > { %p766_p0 = scmp.ne.s32.totalorder %s1062_s11, %s765_s14  ;;  %p772_p1 = scmp.lt.u32.totalorder %s770_s12, %s765_s14 }
  0x3f   : > { %p774_p4 = scmp.lt.u32.totalorder %s765_s14, %s1062_s11 }
  0x40   : > { %p768_p5 = pnand %p767_p3, %p766_p0  ;;  %p773_p2 = por %p772_p1, %p771_p9 }
  0x42   : > { %p769_p7 = pneg %p768_p5  ;;  %p775_p6 = por %p774_p4, %p773_p2 }
  0x44   : > { %p776_p8 = pnand %p775_p6, %p769_p7 }
  0x46   : > { %779 = shalt.err (!%p776_p8)
}
  0x47   : > { %s780_s27 = scalar_lea.vmem %s1064_s22, 128  ;;  %s920_s29 = smov [#allocation3]  }
  0x48   : > { %p781_p12 = scmp.ne.s32.totalorder %s1064_s22, %s780_s27  ;;  %s785_s6 = sshll.u32 %s920_s29, 4  ;;  %s786_s6 = int_to_ptr.vmem [resolvable:$false] %s785_s6 }
  0x49   : > { %s787_s10 = scalar_lea.vmem %s786_s6, 256  ;;  %p788_p5 = scmp.lt.s32.totalorder %s1064_s22, %s786_s6 }
  0x4a   : > { %p783_p11 = pnand %p781_p12, %p767_p3  ;;  %p789_p9 = scmp.lt.s32.totalorder %s787_s10, %s780_s27 }
  0x4c   : > { %p784_p0 = pneg %p783_p11  ;;  %p790_p1 = por %p789_p9, %p788_p5 }
  0x4e   : > { %p791_p2 = pnand %p790_p1, %p784_p0 }
  0x50   : > { %794 = shalt.err (!%p791_p2)
}
  0x51   : > { %s1253_s14 = smov 4   ;;  %s1254_s30 = smov 64  }
  0x52   : > { %666 = dma.hbm_to_vmem [thread:$0]  (!%p1068_p13), %s1062_s11, 128, %s1064_s22, %s1079_s2, %s1254_s30, %s1254_s30, %s1253_s14  }
  0x53   : > { %s228_s12 = sand.u32 1, %s915_s20   ;;  %s795_s8 = scalar_lea.hbm %s1075_s9, 128 }
  0x54   : > { %s1114_s26 = scalar_lea.sflag [#allocation7], %s228_s12  ;;  %p796_p7 = scmp.ne.s32.totalorder %s1075_s9, %s795_s8 }
  0x55   : > { %s800_s6 = scalar_lea.hbm %s1228_s1, 256  ;;  %p801_p8 = scmp.lt.u32.totalorder %s1075_s9, %s1228_s1 }
  0x56   : > { %p798_p4 = pnand %p796_p7, %p767_p3  ;;  %p802_p12 = scmp.lt.u32.totalorder %s800_s6, %s795_s8 }
  0x57   : > { %p804_p0 = scmp.lt.u32.totalorder %s795_s8, %s1075_s9 }
  0x58   : > { %p799_p6 = pneg %p798_p4  ;;  %p803_p11 = por %p802_p12, %p801_p8 }
  0x5a   : > { %p805_p5 = por %p804_p0, %p803_p11 }
  0x5c   : > { %p806_p9 = pnand %p805_p5, %p799_p6 }
  0x5e   : > { %809 = shalt.err (!%p806_p9)
}
  0x5f   : > { %s810_s2 = scalar_lea.vmem %s1111_s13, 128  ;;  %s921_s11 = smov [#allocation6]  }
  0x60   : > { %p811_p1 = scmp.ne.s32.totalorder %s1111_s13, %s810_s2  ;;  %s815_s22 = sshll.u32 %s921_s11, 4  ;;  %s816_s22 = int_to_ptr.vmem [resolvable:$false] %s815_s22 }
  0x61   : > { %s817_s0 = scalar_lea.vmem %s816_s22, 256  ;;  %p818_p4 = scmp.lt.s32.totalorder %s1111_s13, %s816_s22 }
  0x62   : > { %p813_p2 = pnand %p811_p1, %p767_p3  ;;  %p819_p8 = scmp.lt.s32.totalorder %s817_s0, %s810_s2 }
  0x64   : > { %p814_p7 = pneg %p813_p2  ;;  %p820_p12 = por %p819_p8, %p818_p4 }
  0x66   : > { %p821_p11 = pnand %p820_p12, %p814_p7 }
  0x68   : > { %824 = shalt.err (!%p821_p11)
}
  0x69   : > { %669 = dma.hbm_to_vmem [thread:$0]  (!%p1068_p13), %s1075_s9, 128, %s1111_s13, %s1114_s26, %s1254_s30, %s1254_s30, %s1253_s14  }
  0x6a   : > { %p1255_p3 = scmp.ne.s32.totalorder %s1244_s25, 0 }
  0x6b   : > { %s1146_s12 = sand.u32 (!%p1255_p3), 1, %s899_s16   ;;  %p1256_p6 = scmp.ne.s32.totalorder (!%p1255_p3), %s1242_s23, 0 }
  0x6c   : > { %253 = sbr.rel (%p1255_p3) target bundleno = 587 (0x24b), region = 36  ;;  %s611_s8 = sshll.u32 (!%p1255_p3), %s1146_s12, 3 }
  0x6d   : > { %s256_s27 = scalar_lea.sflag (!%p1255_p3), [#allocation4], %s1146_s12  ;;  %s259_s29 = scalar_lea.vmem (!%p1255_p3), [#allocation3], %s611_s8 }
  0x73   : > { %878 = dma.done.wait (%p1256_p6), %s256_s27, 128  }
  0x74   : > { %880 = vsyncadd (%p1256_p6), %s256_s27, 4294967168  ;;  %s264_s13 = sand.u32 1, %s983_s21   ;;  %s268_s25 = scalar_lea.vmem [#allocation6], %s611_s8 }
  0x75   : > { %s265_s5 = scalar_lea.sflag [#allocation7], %s264_s13 }
  0x76   : > { %882 = dma.done.wait (%p1256_p6), %s265_s5, 128  }
  0x77   : > { %884 = vsyncadd (%p1256_p6), %s265_s5, 4294967168  ;;  %p1257_p13 = scmp.eq.s32.totalorder %s983_s21, 0 }
  0x79   : > { %886 = dma.done.wait (%p1257_p13), [#allocation7], 256   ;;  %p1258_p0 = pmov %p1257_p13 }
  0x7a   : > { %vm310_vm0 = vcmask 261120   ;;  %v922_v0 = vmov 0.0   ;;  %vm923_vm1 = vmmov 0   ;;  %v733_v1 = vld [vmem:[%s268_s25] sm:$0xff]   ;;  %v734_v2 = vld [vmem:[%s259_s29] sm:$0xff]   ;;  %vm330_vm2 = vcmask 130048  }
  0x7b   : > { %888 = vsyncadd (%p1258_p0), [#allocation7], 4294967040  ;;  %635 = vmatprep.subr.bf16.mxu0 %v922_v0  ;;  %637 = vmatprep.mubr.msk.bf16.mxu0 %vm923_vm1, %v922_v0  ;;  %311 = vst.msk [vmem:[#allocation2] sm:$0xff] %vm310_vm0, %v922_v0  ;;  %v735_v3 = vld [vmem:[#allocation8] sm:$0xff]   ;;  %v736_v4 = vld [vmem:[#allocation8 + $0x8] sm:$0xff]   ;;  %s614_s21 = sshll.u32 %s1146_s12, 4 }
  0x7c   : > { %312 = vst.msk [vmem:[#allocation2 + $0x8] sm:$0xff] %vm310_vm0, %v922_v0  ;;  %641 = vmatprep.subr.bf16.mxu1 %v922_v0  ;;  %645 = vmatprep.mubr.msk.bf16.mxu1 %vm923_vm1, %v922_v0  ;;  %v618_v16 = vld [vmem:[%s1230_s3] ss:$0 sm:$0xff]  ;;  %s301_s14 = scalar_lea.vmem [#allocation9], %s614_s21  ;;  %s629_s26 = sshll.u32 %s907_s18, 8 }
  0x7d   : > { %636 = vmatpush3.bf16.msra.mxu0 %v733_v1  ;;  %642 = vmatpush3.bf16.msra.mxu1 %v735_v3  ;;  %s473_s30 = sshll.u32 %s301_s14, 4  ;;  %s1178_s2 = scalar_lea.hbm %s1231_s4, %s629_s26  ;;  %s1173_s30 = int_to_ptr.vmem [resolvable:$true] %s473_s30 }
  0x7e   : > { %643 = vmatprep.subr.bf16.mxu1 %v922_v0  ;;  %s458_s11 = scalar_lea.sflag [#allocation5], %s1146_s12  ;;  %s825_s22 = scalar_lea.vmem %s1173_s30, 256 }
  0x7f   : > { %p826_p5 = scmp.ne.s32.totalorder %s1173_s30, %s825_s22  ;;  %s924_s18 = smov [#allocation9]  }
  0x80   : > { %638 = vmatmul.mubr.msk.bf16.vlgmr.msra.gmra.mrb[0].mxu0 %vm330_vm2, %v734_v2  ;;  %s829_s0 = sshll.u32 %s924_s18, 4  ;;  %s830_s0 = int_to_ptr.vmem [resolvable:$false] %s829_s0 }
  0x81   : > { %644 = vmatpush3.bf16.msra.mxu1 %v736_v4  ;;  %p827_p9 = pnand %p826_p5, %p1047_p10  ;;  %s831_s8 = scalar_lea.vmem %s830_s0, 512 }
  0x82   : > { %v313_v5 = vld [vmem:[#allocation2] sm:$0xff]  ;;  %p832_p2 = scmp.lt.s32.totalorder %s1173_s30, %s830_s0  ;;  %p833_p7 = scmp.lt.s32.totalorder %s831_s8, %s825_s22 }
  0x83   : > { %v314_v7 = vld [vmem:[#allocation2 + $0x8] sm:$0xff]  ;;  %p828_p1 = pneg %p827_p9 }
  0x84   : > { %p834_p4 = por %p833_p7, %p832_p2 }
  0x86   : > { %p835_p8 = pnand %p834_p4, %p828_p1 }
 0x153   : > { %v368_v6 = vpop.f32.mrb[0].mxu0 }
 0x154   : > { %v375_v8 = vadd.f32 %v368_v6, %v313_v5  ;;  %v639_v9 = vpop.f32.mrb[1].mxu0 }
 0x155   : > { %v371_v10 = vpop.f32.mrb[2].mxu0 }
 0x156   : > { %378 = vst.msk [vmem:[#allocation2] sm:$0xff] %vm310_vm0, %v375_v8  ;;  %v376_v11 = vadd.f32 %v371_v10, %v314_v7  ;;  %v640_v12 = vpop.f32.mrb[3].mxu0 }
 0x158   : > { %379 = vst.msk [vmem:[#allocation2 + $0x8] sm:$0xff] %vm310_vm0, %v376_v11 }
 0x15d   : > { %v383_v13 = vld [vmem:[#allocation2] sm:$0xff] }
 0x15f   : > { %v384_v14 = vld [vmem:[#allocation2 + $0x8] sm:$0xff] }
 0x160   : > { %v385_v15 = vpack.c.bf16 %v384_v14, %v383_v13 }
 0x162   : > { %646 = vmatmul.mubr.msk.bf16.vlgmr.msra.gmra.mrb[0].mxu1 %vm310_vm0, %v385_v15 }
 0x235   : > { %v446_v17 = vpop.f32.mrb[0].mxu1 }
 0x236   : > { %v447_v18 = vadd.f32 %v618_v16, %v446_v17  ;;  %v647_v19 = vpop.f32.mrb[1].mxu1 }
 0x237   : > { %v449_v20 = vpop.f32.mrb[2].mxu1 }
 0x238   : > { %v453_v21 = vmax.f32 %v447_v18, 0.0  ;;  %v450_v22 = vadd.f32 %v618_v16, %v449_v20  ;;  %v648_v23 = vpop.f32.mrb[3].mxu1 }
 0x23a   : > { %455 = vst [vmem:[%s301_s14] sm:$0xff] %v453_v21  ;;  %v454_v24 = vmax.f32 %v450_v22, 0.0 }
 0x23c   : > { %456 = vst [vmem:[%s301_s14 + $0x8] sm:$0xff] %v454_v24 }
 0x23d   : > { %838 = shalt.err (!%p835_p8)
}
 0x23e   : > { %s839_s27 = scalar_lea.hbm %s1178_s2, 256  ;;  %s843_s5 = scalar_lea.hbm %s1231_s4, 512 }
 0x23f   : > { %p840_p12 = scmp.ne.s32.totalorder %s1178_s2, %s839_s27  ;;  %p844_p6 = scmp.lt.u32.totalorder %s1178_s2, %s1231_s4 }
 0x240   : > { %p845_p13 = scmp.lt.u32.totalorder %s843_s5, %s839_s27  ;;  %p847_p5 = scmp.lt.u32.totalorder %s839_s27, %s1178_s2 }
 0x241   : > { %p841_p11 = pnand %p840_p12, %p1047_p10 }
 0x242   : > { %p846_p0 = por %p845_p13, %p844_p6 }
 0x243   : > { %p842_p3 = pneg %p841_p11 }
 0x244   : > { %p848_p9 = por %p847_p5, %p846_p0 }
 0x246   : > { %p849_p1 = pnand %p848_p9, %p842_p3 }
 0x248   : > { %852 = shalt.err (!%p849_p1)
}
 0x249   : > { %s925_s23 = smov 128   ;;  %s926_s9 = smov 8  }
 0x24a   : > { %657 = dma.vmem_to_hbm [thread:$0]  (%p1047_p10), %s1173_s30, 256, %s1178_s2, %s458_s11, %s925_s23, %s925_s23, %s926_s9  }
 0x24b PF: > { %s488_s14 = sand.u32 1, %s895_s15   ;;  %p1259_p2 = scmp.ne.s32.totalorder %s1243_s24, 0 }
 0x24c   : > { %p1260_p7 = scmp.ge.s32.totalorder %s915_s20, 2  ;;  %s489_s26 = scalar_lea.sflag [#allocation5], %s488_s14 }
 0x24e   : > { %p671_p4 = pnand %p1260_p7, %p1259_p2 }
 0x250   : > { %890 = dma.done.wait (!%p671_p4), %s489_s26, 256  }
 0x251   : > { %892 = vsyncadd (!%p671_p4), %s489_s26, 4294967040  ;;  %s23_s20 = sadd.s32 1, %s915_s20   ;;  %s1261_s28 = sld [smem:[#allocation14_spill]] }
 0x252   : > { %p20_p8 = scmp.ge.s32.totalorder %s23_s20, 4   ;;  %s1262_s15 = smov %s899_s16 }
 0x253   : > { %s1263_s16 = smov %s903_s17  ;;  %s1264_s17 = smov %s1056_s7 }
 0x254   : > { %s1265_s18 = smov %s911_s19  ;;  %22 = sbr.rel (!%p20_p8) target bundleno = 11 (0xb), region = 106 }
 0x257   : > { %s1266_s19 = smov %s1261_s28 }
 0x25b   :  { %494 = vsyncpa [#allocation4], 1 }
 0x25c   :  { %496 = vsyncpa [#allocation4 + $0x1], 1 }
 0x25d   :  { %497 = vsyncpa [#allocation7], 1 }
 0x25e   :  { %499 = vsyncpa [#allocation7 + $0x1], 1 }
 0x25f   :  { %500 = vsyncpa [#allocation5], 1 }
 0x260   :  { %502 = vsyncpa [#allocation5 + $0x1], 1 }

</bundles_post_ra>
